<compile_context>
chip_gen: v5e
topology: v5e:2x2
jax: 0.10.0
libtpu: 0.0.40
codegen_flags: <defaults>
</compile_context>

<pallas_src>
import functools

import jax
import jax.numpy as jnp
from jax import lax
from jax.experimental import pallas as pl
from jax.experimental.pallas import tpu as pltpu

LANES = 128
MAX_TILE_ROWS = 4096  # f32: 2 inputs x 2 bufs x 2 MiB = 8 MiB (+8 KiB acc) -> fits all gens


def _round_up(x: int, m: int) -> int:
    return ((x + m - 1) // m) * m


def _tensorcores_per_device() -> int:
    """How many TensorCores a single JAX device exposes (megacore/v7x -> 2)."""
    try:
        info = pltpu.get_tpu_info()
        for attr in ("num_cores", "core_count", "num_tensorcores",
                     "tensorcore_count", "num_tensor_cores"):
            n = getattr(info, attr, None)
            if isinstance(n, int) and 1 <= n <= 8:
                return n
    except Exception:
        pass
    try:
        kind = jax.devices()[0].device_kind.lower()
    except Exception:
        return 1
    # Single-TC generations first (v5e reports "v5 lite"; v6e is single TC).
    if ("lite" in kind) or ("v5e" in kind) or ("v6" in kind) \
            or ("v2" in kind) or ("v3" in kind):
        return 1
    # Megacore (v4, v5p) and v7x expose 2 TensorCores per device.
    if ("v4" in kind) or ("v5p" in kind) or ("v7" in kind) or ("tpu7" in kind) \
            or ("7x" in kind):
        return 2
    return 1


def _loss_kernel(yhat_ref, y_ref, out_sq_ref, out_ab_ref, acc_sq, acc_ab, *,
                 rows, steps, tile_rows):
    j = pl.program_id(0)  # parallel split (2 TensorCores on v7x/megacore)
    k = pl.program_id(1)  # sequential reduction axis

    @pl.when(k == 0)
    def _():
        acc_sq[...] = jnp.zeros_like(acc_sq)
        acc_ab[...] = jnp.zeros_like(acc_ab)

    # Tile-local bookkeeping: how many rows of this tile are real data.
    t = j * steps + k                                   # logical tile index
    remaining = jnp.int32(rows) - t * jnp.int32(tile_rows)

    def accumulate(d):
        # Fold the (tile_rows,128) chunk to one vreg per statistic:
        # vreg-aligned adds only (each (8,128) slice is exactly one f32 vreg).
        sq = (d * d).reshape(tile_rows // 8, 8, LANES).sum(axis=0)
        ab = jnp.abs(d).reshape(tile_rows // 8, 8, LANES).sum(axis=0)
        acc_sq[...] += sq
        acc_ab[...] += ab

    # Fast path: full tile, no masking work at all (the common case).
    @pl.when(remaining >= tile_rows)
    def _():
        d = yhat_ref[...].astype(jnp.float32) - y_ref[...].astype(jnp.float32)
        accumulate(d)

    # Slow path: final partial tile only.  Select BEFORE the arithmetic so
    # NaN/Inf garbage in the overhang rows is discarded (not multiplied by 0).
    @pl.when(jnp.logical_and(remaining > 0, remaining < tile_rows))
    def _():
        d = yhat_ref[...].astype(jnp.float32) - y_ref[...].astype(jnp.float32)
        valid = lax.broadcasted_iota(jnp.int32, d.shape, 0) < remaining
        accumulate(jnp.where(valid, d, 0.0))

    # remaining <= 0 (redundant clamped step when tiles_total is odd on a
    # 2-way split): skip all compute; the DMA'd tile is simply ignored.

    @pl.when(k == pl.num_programs(1) - 1)
    def _():
        out_sq_ref[...] = acc_sq[...]
        out_ab_ref[...] = acc_ab[...]


def _run_kernel(yf2d: jax.Array, xf2d: jax.Array):
    rows = yf2d.shape[0]

    # Biggest tile that fits comfortably; multiple of 16 so bf16 inputs also
    # satisfy the sublane tiling constraint.
    tile_rows = min(MAX_TILE_ROWS, _round_up(rows, 16))
    tiles_total = pl.cdiv(rows, tile_rows)

    # Generation-aware parallel split: only where >1 TensorCore per device.
    n_cores = _tensorcores_per_device()
    splits = n_cores if (n_cores > 1 and tiles_total >= n_cores) else 1
    steps = pl.cdiv(tiles_total, splits)

    if splits * steps == tiles_total:
        in_index = lambda j, k: (j * steps + k, 0)
    else:
        # Odd tile count with a 2-way split: clamp the redundant final step;
        # the kernel skips its accumulation (remaining <= 0).
        last = tiles_total - 1
        in_index = lambda j, k: (jnp.minimum(j * steps + k, last), 0)

    kernel = functools.partial(
        _loss_kernel, rows=rows, steps=steps, tile_rows=tile_rows)

    itemsize = yf2d.dtype.itemsize
    n_main = rows * LANES
    cost = pl.CostEstimate(
        flops=5 * n_main,
        transcendentals=0,
        bytes_accessed=2 * n_main * itemsize + 2 * splits * 8 * LANES * 4,
    )

    out_sq, out_ab = pl.pallas_call(
        kernel,
        out_shape=(
            jax.ShapeDtypeStruct((splits * 8, LANES), jnp.float32),
            jax.ShapeDtypeStruct((splits * 8, LANES), jnp.float32),
        ),
        grid_spec=pltpu.PrefetchScalarGridSpec(
            num_scalar_prefetch=0,
            grid=(splits, steps),
            in_specs=[
                pl.BlockSpec((tile_rows, LANES), in_index),
                pl.BlockSpec((tile_rows, LANES), in_index),
            ],
            out_specs=[
                pl.BlockSpec((8, LANES), lambda j, k: (j, 0)),
                pl.BlockSpec((8, LANES), lambda j, k: (j, 0)),
            ],
            scratch_shapes=[
                pltpu.VMEM((8, LANES), jnp.float32),  # running sum of d^2
                pltpu.VMEM((8, LANES), jnp.float32),  # running sum of |d|
            ],
        ),
        compiler_params=pltpu.CompilerParams(
            dimension_semantics=("parallel", "arbitrary"),
        ),
        cost_estimate=cost,
    )(yf2d, xf2d)
    return out_sq, out_ab


def custom_loss(yhat: jax.Array, y: jax.Array) -> jax.Array:
    assert yhat.shape == y.shape, "yhat and y must have the same shape"
    n_elems = yhat.size

    yf = yhat.reshape(-1)
    xf = y.reshape(-1)
    n_main = (n_elems // LANES) * LANES   # lane-aligned prefix handled by the kernel

    total_sq = jnp.float32(0.0)
    total_ab = jnp.float32(0.0)

    if n_main > 0:
        if n_main == n_elems:
            ym = yf.reshape(n_main // LANES, LANES)
            xm = xf.reshape(n_main // LANES, LANES)
        else:
            ym = yf[:n_main].reshape(n_main // LANES, LANES)
            xm = xf[:n_main].reshape(n_main // LANES, LANES)
        out_sq, out_ab = _run_kernel(ym, xm)
        total_sq = jnp.sum(out_sq)
        total_ab = jnp.sum(out_ab)

    if n_main != n_elems:
        # <=127-element tail folded in as a trivial scalar-sized JAX op.
        dt = yf[n_main:].astype(jnp.float32) - xf[n_main:].astype(jnp.float32)
        total_sq = total_sq + jnp.sum(dt * dt)
        total_ab = total_ab + jnp.sum(jnp.abs(dt))

    inv_n = jnp.float32(1.0 / n_elems)
    return (jnp.sqrt(total_sq * inv_n) * jnp.float32(0.6)
            + total_ab * inv_n * jnp.float32(0.4))


def _reference_loss(yhat, y):
    d = yhat.astype(jnp.float32) - y.astype(jnp.float32)
    rmse = jnp.sqrt(jnp.mean(d * d))
    mae = jnp.mean(jnp.abs(d))
    return rmse * 0.6 + mae * 0.4


if __name__ == "__main__":
    key = jax.random.PRNGKey(0)
    k1, k2 = jax.random.split(key)
    shape = (2, 4, 16, 16)  # NCHW, as the torch module would typically see
    yhat = jax.random.normal(k1, shape, dtype=jnp.float32)
    y = jax.random.normal(k2, shape, dtype=jnp.float32)

    loss = custom_loss(yhat, y)
    jax.block_until_ready(loss)

    ref = _reference_loss(yhat, y)
    assert jnp.allclose(loss, ref, rtol=1e-5, atol=1e-6), (loss, ref)
    print("KERNEL_OK")
</pallas_src>

<mosaic_0001>
module attributes {stable_mosaic.version = 11 : i64} {
  func.func @_loss_kernel(%arg0: i32, %arg1: i32, %arg2: memref<16x128xf32, #tpu.memory_space<vmem>>, %arg3: memref<16x128xf32, #tpu.memory_space<vmem>>, %arg4: memref<8x128xf32, #tpu.memory_space<vmem>>, %arg5: memref<8x128xf32, #tpu.memory_space<vmem>>, %arg6: memref<8x128xf32, #tpu.memory_space<vmem>>, %arg7: memref<8x128xf32, #tpu.memory_space<vmem>>) attributes {dimension_semantics = [#tpu.dimension_semantics<parallel>, #tpu.dimension_semantics<arbitrary>], iteration_bounds = array<i64: 1, 1>, scalar_prefetch = 0 : i64, scratch_operands = 2 : i64, tpu.core_type = #tpu.core_type<tc>, window_params = [{transform_indices = @transform_0, window_bounds = array<i64: 16, 128>}, {transform_indices = @transform_1, window_bounds = array<i64: 16, 128>}, {transform_indices = @transform_2, window_bounds = array<i64: 8, 128>}, {transform_indices = @transform_3, window_bounds = array<i64: 8, 128>}]} {
    %c0_i32 = arith.constant 0 : i32
    %0 = arith.cmpi eq, %arg1, %c0_i32 : i32
    %1 = arith.extui %0 : i1 to i32
    %c0_i32_0 = arith.constant 0 : i32
    %2 = arith.cmpi ne, %1, %c0_i32_0 : i32
    scf.if %2 {
      %cst = arith.constant 0.000000e+00 : f32
      %18 = vector.broadcast %cst : f32 to vector<8x128xf32>
      %c0 = arith.constant 0 : index
      %c0_9 = arith.constant 0 : index
      %19 = vector.load %arg6[%c0, %c0_9] : memref<8x128xf32, #tpu.memory_space<vmem>>, vector<8x128xf32>
      tpu.vector_store %arg6[%c0, %c0_9], %18 {strides = array<i32>} : memref<8x128xf32, #tpu.memory_space<vmem>>, vector<8x128xf32>,
      %cst_10 = arith.constant 0.000000e+00 : f32
      %20 = vector.broadcast %cst_10 : f32 to vector<8x128xf32>
      %c0_11 = arith.constant 0 : index
      %c0_12 = arith.constant 0 : index
      %21 = vector.load %arg7[%c0_11, %c0_12] : memref<8x128xf32, #tpu.memory_space<vmem>>, vector<8x128xf32>
      tpu.vector_store %arg7[%c0_11, %c0_12], %20 {strides = array<i32>} : memref<8x128xf32, #tpu.memory_space<vmem>>, vector<8x128xf32>,
    } else {
    }
    %c1_i32 = arith.constant 1 : i32
    %3 = arith.muli %arg0, %c1_i32 : i32
    %4 = arith.addi %3, %arg1 : i32
    %c16_i32 = arith.constant 16 : i32
    %5 = arith.muli %4, %c16_i32 : i32
    %c16_i32_1 = arith.constant 16 : i32
    %6 = arith.subi %c16_i32_1, %5 : i32
    %c16_i32_2 = arith.constant 16 : i32
    %7 = arith.cmpi sge, %6, %c16_i32_2 : i32
    %8 = arith.extui %7 : i1 to i32
    %c0_i32_3 = arith.constant 0 : i32
    %9 = arith.cmpi ne, %8, %c0_i32_3 : i32
    scf.if %9 {
      %c0 = arith.constant 0 : index
      %c0_9 = arith.constant 0 : index
      %18 = vector.load %arg2[%c0, %c0_9] : memref<16x128xf32, #tpu.memory_space<vmem>>, vector<16x128xf32>
      %c0_10 = arith.constant 0 : index
      %c0_11 = arith.constant 0 : index
      %19 = vector.load %arg3[%c0_10, %c0_11] : memref<16x128xf32, #tpu.memory_space<vmem>>, vector<16x128xf32>
      %20 = arith.subf %18, %19 : vector<16x128xf32>
      %21 = arith.mulf %20, %20 : vector<16x128xf32>
      %22 = vector.shape_cast %21 : vector<16x128xf32> to vector<2x8x128xf32>
      %cst = arith.constant dense<0.000000e+00> : vector<8x128xf32>
      %23 = vector.multi_reduction <add>, %22, %cst [0] : vector<2x8x128xf32> to vector<8x128xf32>
      %24 = math.absf %20 : vector<16x128xf32>
      %25 = vector.shape_cast %24 : vector<16x128xf32> to vector<2x8x128xf32>
      %cst_12 = arith.constant dense<0.000000e+00> : vector<8x128xf32>
      %26 = vector.multi_reduction <add>, %25, %cst_12 [0] : vector<2x8x128xf32> to vector<8x128xf32>
      %c0_13 = arith.constant 0 : index
      %c0_14 = arith.constant 0 : index
      %27 = vector.load %arg6[%c0_13, %c0_14] : memref<8x128xf32, #tpu.memory_space<vmem>>, vector<8x128xf32>
      %28 = arith.addf %27, %23 : vector<8x128xf32>
      %c0_15 = arith.constant 0 : index
      %c0_16 = arith.constant 0 : index
      %29 = vector.load %arg6[%c0_15, %c0_16] : memref<8x128xf32, #tpu.memory_space<vmem>>, vector<8x128xf32>
      tpu.vector_store %arg6[%c0_15, %c0_16], %28 {strides = array<i32>} : memref<8x128xf32, #tpu.memory_space<vmem>>, vector<8x128xf32>,
      %c0_17 = arith.constant 0 : index
      %c0_18 = arith.constant 0 : index
      %30 = vector.load %arg7[%c0_17, %c0_18] : memref<8x128xf32, #tpu.memory_space<vmem>>, vector<8x128xf32>
      %31 = arith.addf %30, %26 : vector<8x128xf32>
      %c0_19 = arith.constant 0 : index
      %c0_20 = arith.constant 0 : index
      %32 = vector.load %arg7[%c0_19, %c0_20] : memref<8x128xf32, #tpu.memory_space<vmem>>, vector<8x128xf32>
      tpu.vector_store %arg7[%c0_19, %c0_20], %31 {strides = array<i32>} : memref<8x128xf32, #tpu.memory_space<vmem>>, vector<8x128xf32>,
    } else {
    }
    %c0_i32_4 = arith.constant 0 : i32
    %10 = arith.cmpi sgt, %6, %c0_i32_4 : i32
    %c16_i32_5 = arith.constant 16 : i32
    %11 = arith.cmpi slt, %6, %c16_i32_5 : i32
    %12 = arith.andi %10, %11 : i1
    %13 = arith.extui %12 : i1 to i32
    %c0_i32_6 = arith.constant 0 : i32
    %14 = arith.cmpi ne, %13, %c0_i32_6 : i32
    scf.if %14 {
      %c0 = arith.constant 0 : index
      %c0_9 = arith.constant 0 : index
      %18 = vector.load %arg2[%c0, %c0_9] : memref<16x128xf32, #tpu.memory_space<vmem>>, vector<16x128xf32>
      %c0_10 = arith.constant 0 : index
      %c0_11 = arith.constant 0 : index
      %19 = vector.load %arg3[%c0_10, %c0_11] : memref<16x128xf32, #tpu.memory_space<vmem>>, vector<16x128xf32>
      %20 = arith.subf %18, %19 : vector<16x128xf32>
      %21 = tpu.iota {dimensions = array<i32: 0>} : vector<16x128xi32>
      %22 = vector.broadcast %6 : i32 to vector<16x128xi32>
      %23 = arith.cmpi slt, %21, %22 : vector<16x128xi32>
      %cst = arith.constant 0.000000e+00 : f32
      %24 = vector.broadcast %cst : f32 to vector<16x128xf32>
      %25 = arith.select %23, %20, %24 : vector<16x128xi1>, vector<16x128xf32>
      %26 = arith.mulf %25, %25 : vector<16x128xf32>
      %27 = vector.shape_cast %26 : vector<16x128xf32> to vector<2x8x128xf32>
      %cst_12 = arith.constant dense<0.000000e+00> : vector<8x128xf32>
      %28 = vector.multi_reduction <add>, %27, %cst_12 [0] : vector<2x8x128xf32> to vector<8x128xf32>
      %29 = math.absf %25 : vector<16x128xf32>
      %30 = vector.shape_cast %29 : vector<16x128xf32> to vector<2x8x128xf32>
      %cst_13 = arith.constant dense<0.000000e+00> : vector<8x128xf32>
      %31 = vector.multi_reduction <add>, %30, %cst_13 [0] : vector<2x8x128xf32> to vector<8x128xf32>
      %c0_14 = arith.constant 0 : index
      %c0_15 = arith.constant 0 : index
      %32 = vector.load %arg6[%c0_14, %c0_15] : memref<8x128xf32, #tpu.memory_space<vmem>>, vector<8x128xf32>
      %33 = arith.addf %32, %28 : vector<8x128xf32>
      %c0_16 = arith.constant 0 : index
      %c0_17 = arith.constant 0 : index
      %34 = vector.load %arg6[%c0_16, %c0_17] : memref<8x128xf32, #tpu.memory_space<vmem>>, vector<8x128xf32>
      tpu.vector_store %arg6[%c0_16, %c0_17], %33 {strides = array<i32>} : memref<8x128xf32, #tpu.memory_space<vmem>>, vector<8x128xf32>,
      %c0_18 = arith.constant 0 : index
      %c0_19 = arith.constant 0 : index
      %35 = vector.load %arg7[%c0_18, %c0_19] : memref<8x128xf32, #tpu.memory_space<vmem>>, vector<8x128xf32>
      %36 = arith.addf %35, %31 : vector<8x128xf32>
      %c0_20 = arith.constant 0 : index
      %c0_21 = arith.constant 0 : index
      %37 = vector.load %arg7[%c0_20, %c0_21] : memref<8x128xf32, #tpu.memory_space<vmem>>, vector<8x128xf32>
      tpu.vector_store %arg7[%c0_20, %c0_21], %36 {strides = array<i32>} : memref<8x128xf32, #tpu.memory_space<vmem>>, vector<8x128xf32>,
    } else {
    }
    %c0_i32_7 = arith.constant 0 : i32
    %15 = arith.cmpi eq, %arg1, %c0_i32_7 : i32
    %16 = arith.extui %15 : i1 to i32
    %c0_i32_8 = arith.constant 0 : i32
    %17 = arith.cmpi ne, %16, %c0_i32_8 : i32
    scf.if %17 {
      %c0 = arith.constant 0 : index
      %c0_9 = arith.constant 0 : index
      %18 = vector.load %arg6[%c0, %c0_9] : memref<8x128xf32, #tpu.memory_space<vmem>>, vector<8x128xf32>
      %c0_10 = arith.constant 0 : index
      %c0_11 = arith.constant 0 : index
      %19 = vector.load %arg4[%c0_10, %c0_11] : memref<8x128xf32, #tpu.memory_space<vmem>>, vector<8x128xf32>
      tpu.vector_store %arg4[%c0_10, %c0_11], %18 {strides = array<i32>} : memref<8x128xf32, #tpu.memory_space<vmem>>, vector<8x128xf32>,
      %c0_12 = arith.constant 0 : index
      %c0_13 = arith.constant 0 : index
      %20 = vector.load %arg7[%c0_12, %c0_13] : memref<8x128xf32, #tpu.memory_space<vmem>>, vector<8x128xf32>
      %c0_14 = arith.constant 0 : index
      %c0_15 = arith.constant 0 : index
      %21 = vector.load %arg5[%c0_14, %c0_15] : memref<8x128xf32, #tpu.memory_space<vmem>>, vector<8x128xf32>
      tpu.vector_store %arg5[%c0_14, %c0_15], %20 {strides = array<i32>} : memref<8x128xf32, #tpu.memory_space<vmem>>, vector<8x128xf32>,
    } else {
    }
    return
  }
  func.func @transform_0(%arg0: i32, %arg1: i32) -> (i32, i32) {
    %c1_i32 = arith.constant 1 : i32
    %0 = arith.muli %arg0, %c1_i32 : i32
    %1 = arith.addi %0, %arg1 : i32
    %c0_i32 = arith.constant 0 : i32
    %c0_i32_0 = arith.constant 0 : i32
    return %1, %c0_i32 : i32, i32
  }
  func.func @transform_1(%arg0: i32, %arg1: i32) -> (i32, i32) {
    %c1_i32 = arith.constant 1 : i32
    %0 = arith.muli %arg0, %c1_i32 : i32
    %1 = arith.addi %0, %arg1 : i32
    %c0_i32 = arith.constant 0 : i32
    %c0_i32_0 = arith.constant 0 : i32
    return %1, %c0_i32 : i32, i32
  }
  func.func @transform_2(%arg0: i32, %arg1: i32) -> (i32, i32) {
    %c0_i32 = arith.constant 0 : i32
    %c0_i32_0 = arith.constant 0 : i32
    return %arg0, %c0_i32 : i32, i32
  }
  func.func @transform_3(%arg0: i32, %arg1: i32) -> (i32, i32) {
    %c0_i32 = arith.constant 0 : i32
    %c0_i32_0 = arith.constant 0 : i32
    return %arg0, %c0_i32 : i32, i32
  }
}

</mosaic_0001>

<bundles_post_ra>
// kernel: tpu_custom_call.1
= control target key start
LH: loop header
LB: loop body
LE: loop exit
PB: predicated region body
PF: predicated region fallthrough
CT: control target
= control target key end

     0   :  { %9 = vsyncpa [#allocation5], 0  ;;  %s311_s0 = inlined_call_operand.hbm [shape: f32[16,128], index: 0, kind: input, shape index: {}]   ;;  %s312_s1 = inlined_call_operand.hbm [shape: f32[16,128], index: 1, kind: input, shape index: {}]   ;;  %s313_s2 = inlined_call_operand.hbm [shape: f32[8,128], index: 2, kind: output, shape index: {0}]   ;;  %s314_s3 = inlined_call_operand.hbm [shape: f32[8,128], index: 3, kind: output, shape index: {1}]  }
   0x1   :  { %10 = vsyncpa [#allocation8], 0 }
   0x2   :  { %11 = vsyncpa [#allocation6], 0 }
   0x3   :  { %12 = vsyncpa [#allocation11], 0  ;;  %s21_s14 = sshll.u32 %s311_s0, 4  ;;  %s273_s15 = smov [#allocation4]   ;;  %s22_s14 = int_to_ptr.hbm [resolvable:$true] %s21_s14 }
   0x4   :  { %s23_s16 = sshll.u32 %s273_s15, 4  ;;  %s38_s19 = sshll.u32 %s312_s1, 4  ;;  %s24_s16 = int_to_ptr.vmem [resolvable:$true] %s23_s16  ;;  %s39_s19 = int_to_ptr.hbm [resolvable:$true] %s38_s19 }
   0x5   :  { %s274_s20 = smov 128   ;;  %s275_s21 = smov 8  }
   0x6   :  { %29 = dma.hbm_to_vmem [thread:$0]  %s22_s14, 256, %s24_s16, [#allocation5], %s274_s20, %s274_s20, %s275_s21  }
   0x7   :  { %s276_s22 = smov [#allocation7]  }
   0x8   :  { %s40_s23 = sshll.u32 %s276_s22, 4  ;;  %s41_s23 = int_to_ptr.vmem [resolvable:$true] %s40_s23 }
   0x9   :  { %46 = dma.hbm_to_vmem [thread:$0]  %s39_s19, 256, %s41_s23, [#allocation8], %s274_s20, %s274_s20, %s275_s21  }
   0xa   :  { %265 = dma.done.wait [#allocation5], 256  }
   0xb   :  { %266 = vsyncadd [#allocation5], 4294967040 }
   0xc   :  { %267 = dma.done.wait [#allocation8], 256  }
   0xd   :  { %268 = vsyncadd [#allocation8], 4294967040  ;;  %v72_v0 = vld [vmem:[#allocation4] sm:$0xff]  ;;  %v73_v1 = vld [vmem:[#allocation4 + $0x8] sm:$0xff]  ;;  %s277_s0 = smov [#allocation9]   ;;  %s136_s26 = sshll.u32 %s313_s2, 4  ;;  %s137_s26 = int_to_ptr.hbm [resolvable:$true] %s136_s26 }
   0xe   :  { %v74_v2 = vld [vmem:[#allocation7] sm:$0xff]  ;;  %v75_v3 = vld [vmem:[#allocation7 + $0x8] sm:$0xff]  ;;  %s134_s1 = sshll.u32 %s277_s0, 4  ;;  %s278_s27 = smov [#allocation10]   ;;  %s135_s1 = int_to_ptr.vmem [resolvable:$true] %s134_s1 }
   0xf   :  { %v76_v4 = vsub.f32 %v72_v0, %v74_v2  ;;  %v77_v5 = vsub.f32 %v73_v1, %v75_v3  ;;  %s145_s28 = sshll.u32 %s278_s27, 4  ;;  %s147_s4 = sshll.u32 %s314_s3, 4  ;;  %s146_s28 = int_to_ptr.vmem [resolvable:$true] %s145_s28  ;;  %s148_s4 = int_to_ptr.hbm [resolvable:$true] %s147_s4 }
  0x11   :  { %v78_v6 = vmul.f32 %v76_v4, %v76_v4  ;;  %v81_v7 = vand.u32 2147483647, %v76_v4  ;;  %v79_v8 = vmul.f32 %v77_v5, %v77_v5  ;;  %v82_v9 = vand.u32 2147483647, %v77_v5 }
  0x13   :  { %v80_v10 = vadd.f32 %v79_v8, %v78_v6  ;;  %v83_v11 = vadd.f32 %v82_v9, %v81_v7 }
  0x15   :  { %126 = vst [vmem:[#allocation9] sm:$0xff] %v80_v10 }
  0x16   :  { %128 = vst [vmem:[#allocation10] sm:$0xff] %v83_v11  ;;  %139 = dma.vmem_to_hbm [thread:$0]  %s135_s1, 128, %s137_s26, [#allocation6]  }
  0x17   :  { %150 = dma.vmem_to_hbm [thread:$0]  %s146_s28, 128, %s148_s4, [#allocation11]  }
  0x18   :  { %269 = dma.done.wait [#allocation6], 128  }
  0x19   :  { %270 = vsyncadd [#allocation6], 4294967168 }
  0x1a   :  { %271 = dma.done.wait [#allocation11], 128  }
  0x1b   :  { %272 = vsyncadd [#allocation11], 4294967168 }
  0x1c   :  { %159 = vsyncpa [#allocation5], 1 }
  0x1d   :  { %160 = vsyncpa [#allocation8], 1 }
  0x1e   :  { %161 = vsyncpa [#allocation6], 1 }
  0x1f   :  { %162 = vsyncpa [#allocation11], 1 }

</bundles_post_ra>
